<compile_context>
chip_gen: v5e
topology: v5e:2x2
jax: 0.10.0
libtpu: 0.0.40
codegen_flags: <defaults>
</compile_context>

<pallas_src>
import functools

import jax
import jax.numpy as jnp
from jax.experimental import pallas as pl
from jax.experimental.pallas import tpu as pltpu

# One Newton refinement keeps the approx-reciprocal softmax ~f32-exact.
# (Optional on v7x if the VALU slot ever binds; kept on by default.)
_NEWTON_REFINE = True


def _dice_stats_kernel(x_ref, t_ref, out_ref, *,
                       tiles_per_chunk, n_tiles, padded_tiles, rem, tile_hw):
    """x_ref, t_ref : (1, C, tile_hw) blocks of logits / targets (NCHW order)
    out_ref        : (1, 1, 3, C) per-(batch, chunk) stats; resident across the
                     innermost ('arbitrary') axis and used as the accumulator.
    """
    j = pl.program_id(2)                         # tile within this chunk
    g = pl.program_id(1) * tiles_per_chunk + j   # global spatial tile index

    @pl.when(j == 0)
    def _():
        out_ref[...] = jnp.zeros_like(out_ref)

    def accumulate(x, t, p_mask=None):
        # softmax over the channel (sublane) axis
        m = jnp.max(x, axis=0, keepdims=True)           # (1, tile_hw)
        e = jnp.exp(x - m)                               # EUP
        denom = jnp.sum(e, axis=0, keepdims=True)        # (1, tile_hw)
        r = pl.reciprocal(denom, approx=True)            # EUP slot (free-ish)
        if _NEWTON_REFINE:
            r = r * (2.0 - denom * r)                    # -> ~f32 exact
        p = e * r
        if p_mask is not None:
            p = jnp.where(p_mask, p, 0.0)
        # One 128->1 lane reduction per plane per step, accumulated into the
        # tiny resident output block (no lane-wide scratch RMW traffic).
        stats = jnp.stack([jnp.sum(p * t, axis=-1),
                           jnp.sum(p, axis=-1),
                           jnp.sum(t, axis=-1)], axis=0)     # (3, C)
        out_ref[0, 0] += stats

    full_tiles = n_tiles - (1 if rem else 0)   # tiles with no ragged tail

    if full_tiles > 0:
        if padded_tiles == full_tiles:
            # every grid step is a full, valid tile: no branch needed
            accumulate(x_ref[0].astype(jnp.float32),
                       t_ref[0].astype(jnp.float32))
        else:
            @pl.when(g < full_tiles)
            def _():
                accumulate(x_ref[0].astype(jnp.float32),
                           t_ref[0].astype(jnp.float32))

    if rem:
        # Statically-known ragged tail: mask it in-kernel (no wrapper jnp.pad,
        # no pad-mass correction).  OOB lanes may hold garbage -> select to 0
        # before any arithmetic, and zero p on those lanes before reducing.
        @pl.when(g == n_tiles - 1)
        def _():
            lane = jax.lax.broadcasted_iota(jnp.int32, (1, tile_hw), 1)
            mask = lane < rem
            x = jnp.where(mask, x_ref[0].astype(jnp.float32), 0.0)
            t = jnp.where(mask, t_ref[0].astype(jnp.float32), 0.0)
            accumulate(x, t, p_mask=mask)
    # Chunk-padding tiles (g >= n_tiles) contribute nothing.
    # TODO(synk): for C<=4 on v7x, pack two spatial half-tiles into sublanes
    # (segmented sublane softmax) only if a profile shows the VALU slot binds.


def _vmem_capacity_bytes():
    try:
        return int(pltpu.get_tpu_info().vmem_capacity_bytes)
    except Exception:
        return 64 << 20          # conservative fallback (v7x per-core VMEM)


def _sublane_pad(c, itemsize):
    sub = max(8, 32 // max(itemsize, 1))   # 8 (f32) / 16 (bf16) / 32 (int8)
    return -(-c // sub) * sub


def _pick_tile_hw(hw, c, itemsize, vmem_cap):
    """Largest multiple-of-128 lane count whose sublane-padded input block fits
    the per-buffer budget; no divisor constraint (the tail is masked)."""
    target = (8 << 20) if vmem_cap >= (96 << 20) else (3 << 20)  # v5e/v6e : v7x
    pad_c = _sublane_pad(c, itemsize)
    cap_lanes = max(128, (target // (pad_c * itemsize)) // 128 * 128)
    hw_ceil = -(-hw // 128) * 128
    return int(min(cap_lanes, hw_ceil))


def _dice_stats(x, t, *, tile_hw, n_chunks, tiles_per_chunk, vmem_cap):
    """x, t: (B, C, HW). Returns (B, n_chunks, 3, C) f32 partial stats."""
    b, c, hw = x.shape
    n_tiles = -(-hw // tile_hw)
    padded_tiles = n_chunks * tiles_per_chunk
    rem = hw % tile_hw

    clamp = padded_tiles != n_tiles

    def in_map(i, ci, j):
        g = ci * tiles_per_chunk + j
        if clamp:                                 # chunk-padding tiles re-read
            g = jnp.minimum(g, n_tiles - 1)       # the last valid block
        return (i, 0, g)

    kernel = functools.partial(
        _dice_stats_kernel, tiles_per_chunk=tiles_per_chunk, n_tiles=n_tiles,
        padded_tiles=padded_tiles, rem=rem, tile_hw=tile_hw)

    # VMEM: 2 inputs x 2 pipeline buffers + tiny resident output block.
    itemsize = jnp.dtype(x.dtype).itemsize
    pad_c = _sublane_pad(c, itemsize)
    needed = 2 * 2 * pad_c * tile_hw * itemsize + (4 << 20)
    vmem_limit = int(min(max(needed, 32 << 20), (vmem_cap * 3) // 4))

    return pl.pallas_call(
        kernel,
        out_shape=jax.ShapeDtypeStruct((b, n_chunks, 3, c), jnp.float32),
        grid_spec=pltpu.PrefetchScalarGridSpec(
            num_scalar_prefetch=0,
            grid=(b, n_chunks, tiles_per_chunk),
            in_specs=[
                pl.BlockSpec((1, c, tile_hw), in_map),
                pl.BlockSpec((1, c, tile_hw), in_map),
            ],
            out_specs=pl.BlockSpec((1, 1, 3, c), lambda i, ci, j: (i, ci, 0, 0)),
        ),
        compiler_params=pltpu.CompilerParams(
            dimension_semantics=("parallel", "parallel", "arbitrary"),
            vmem_limit_bytes=vmem_limit,
        ),
    )(x, t)


@functools.partial(jax.jit, static_argnames=("ignore_index", "tile_hw"))
def dice_loss(predict, target, weight=None, ignore_index=None, smooth=1e-6,
              tile_hw=None):
    """Matches DiceLoss.forward: softmax(predict, dim=1), then per-channel
    SingleDiceLoss summed over channels (optionally weighted / one channel
    ignored).  predict, target: NCHW, same shape (bf16 or f32)."""
    assert predict.shape == target.shape, "predict & target shape do not match"
    b, c, h, w = predict.shape
    hw = h * w

    # NCHW is already (B, C, HW)-contiguous -> free reshape, no copies.
    x = predict.reshape(b, c, hw)
    t = target.reshape(b, c, hw)

    vmem_cap = _vmem_capacity_bytes()
    if tile_hw is None:
        tile_hw = _pick_tile_hw(hw, c, jnp.dtype(predict.dtype).itemsize,
                                vmem_cap)

    n_tiles = -(-hw // tile_hw)
    # dual-TC (v7x) utilization: ensure an even number of 'parallel' work units
    # when the batch alone would leave one TensorCore idle.
    n_chunks = 2 if (n_tiles >= 2 and b % 2 == 1) else 1
    tiles_per_chunk = -(-n_tiles // n_chunks)
    n_chunks = -(-n_tiles // tiles_per_chunk)

    partials = _dice_stats(x, t, tile_hw=tile_hw, n_chunks=n_chunks,
                           tiles_per_chunk=tiles_per_chunk, vmem_cap=vmem_cap)
    stats = jnp.sum(partials, axis=(0, 1))               # (3, C)
    inter, psum, tsum = stats[0], stats[1], stats[2]

    per_channel = 1.0 - (2.0 * inter + smooth) / (psum + tsum + smooth)

    if weight is not None:
        per_channel = per_channel * weight.astype(per_channel.dtype)
    if ignore_index is not None:
        chan_mask = (jnp.arange(c) != ignore_index).astype(per_channel.dtype)
        per_channel = per_channel * chan_mask

    return jnp.sum(per_channel)


def _reference_dice_loss(predict, target, weight=None, ignore_index=None,
                         smooth=1e-6):
    # pure-JAX mirror of the PyTorch DiceLoss
    p = jax.nn.softmax(predict.astype(jnp.float32), axis=1)
    t = target.astype(jnp.float32)
    loss = 0.0
    for i in range(target.shape[1]):
        if i == ignore_index:
            continue
        pi, ti = p[:, i], t[:, i]
        inter = jnp.sum(pi * ti)
        li = 1.0 - (2.0 * inter + smooth) / (jnp.sum(pi) + jnp.sum(ti) + smooth)
        if weight is not None:
            li = li * weight[i]
        loss = loss + li
    return loss


if __name__ == "__main__":
    key = jax.random.PRNGKey(0)
    k1, k2, k3, k4, k5, k6 = jax.random.split(key, 6)

    def make_inputs(k_logits, k_labels, b, c, h, w, dtype=jnp.float32):
        logits = jax.random.normal(k_logits, (b, c, h, w), dtype=jnp.float32)
        labels = jax.random.randint(k_labels, (b, h, w), 0, c)
        onehot = jnp.transpose(jax.nn.one_hot(labels, c, dtype=jnp.float32),
                               (0, 3, 1, 2))                     # NCHW
        return logits.astype(dtype), onehot.astype(dtype)

    # Case 1: H*W a multiple of 128 (full tiles, no masking).
    p1, t1 = make_inputs(k1, k2, 2, 4, 16, 16)
    out1 = jax.block_until_ready(dice_loss(p1, t1))
    ref1 = _reference_dice_loss(p1, t1)
    assert jnp.allclose(out1, ref1, atol=1e-4, rtol=1e-4), (out1, ref1)

    # Case 2: ragged H*W (10*10 = 100) -> in-kernel lane-mask path.
    p2, t2 = make_inputs(k3, k4, 2, 4, 10, 10)
    out2 = jax.block_until_ready(dice_loss(p2, t2))
    ref2 = _reference_dice_loss(p2, t2)
    assert jnp.allclose(out2, ref2, atol=1e-4, rtol=1e-4), (out2, ref2)

    # Case 3: batch 1, forced 128-lane tiles -> multi-tile, 2 spatial chunks,
    # chunk-padding (skipped) tiles, ragged tail, plus weight / ignore_index.
    p3, t3 = make_inputs(k5, k6, 1, 4, 24, 24)
    wgt = jnp.array([0.5, 1.0, 2.0, 1.5], dtype=jnp.float32)
    out3 = jax.block_until_ready(
        dice_loss(p3, t3, weight=wgt, ignore_index=2, tile_hw=128))
    ref3 = _reference_dice_loss(p3, t3, weight=wgt, ignore_index=2)
    assert jnp.allclose(out3, ref3, atol=1e-4, rtol=1e-4), (out3, ref3)

    # Case 4: bf16 inputs streamed as-is (half the HBM traffic), f32 compute.
    out4 = jax.block_until_ready(dice_loss(p1.astype(jnp.bfloat16),
                                           t1.astype(jnp.bfloat16)))
    ref4 = _reference_dice_loss(p1.astype(jnp.bfloat16),
                                t1.astype(jnp.bfloat16))
    assert jnp.allclose(out4, ref4, atol=1e-3, rtol=1e-3), (out4, ref4)

    print("KERNEL_OK")
</pallas_src>

<mosaic_0001>
module attributes {stable_mosaic.version = 11 : i64} {
  func.func @_dice_stats_kernel(%arg0: i32, %arg1: i32, %arg2: i32, %arg3: memref<1x4x256xf32, #tpu.memory_space<vmem>>, %arg4: memref<1x4x256xf32, #tpu.memory_space<vmem>>, %arg5: memref<1x1x3x4xf32, #tpu.memory_space<vmem>>) attributes {dimension_semantics = [#tpu.dimension_semantics<parallel>, #tpu.dimension_semantics<parallel>, #tpu.dimension_semantics<arbitrary>], iteration_bounds = array<i64: 2, 1, 1>, scalar_prefetch = 0 : i64, scratch_operands = 0 : i64, tpu.core_type = #tpu.core_type<tc>, window_params = [{transform_indices = @transform_0, window_bounds = array<i64: 1, 4, 256>}, {transform_indices = @transform_1, window_bounds = array<i64: 1, 4, 256>}, {transform_indices = @transform_2, window_bounds = array<i64: 1, 1, 3, 4>}]} {
    %c0_i32 = arith.constant 0 : i32
    %0 = arith.cmpi eq, %arg2, %c0_i32 : i32
    %1 = arith.extui %0 : i1 to i32
    %c0_i32_0 = arith.constant 0 : i32
    %2 = arith.cmpi ne, %1, %c0_i32_0 : i32
    scf.if %2 {
      %cst_19 = arith.constant 0.000000e+00 : f32
      %35 = vector.broadcast %cst_19 : f32 to vector<1x1x3x4xf32>
      %c0_20 = arith.constant 0 : index
      %c0_21 = arith.constant 0 : index
      %c0_22 = arith.constant 0 : index
      %c0_23 = arith.constant 0 : index
      %36 = vector.load %arg5[%c0_20, %c0_21, %c0_22, %c0_23] : memref<1x1x3x4xf32, #tpu.memory_space<vmem>>, vector<1x1x3x4xf32>
      tpu.vector_store %arg5[%c0_20, %c0_21, %c0_22, %c0_23], %35 {strides = array<i32>} : memref<1x1x3x4xf32, #tpu.memory_space<vmem>>, vector<1x1x3x4xf32>,
    } else {
    }
    %c0 = arith.constant 0 : index
    %c0_1 = arith.constant 0 : index
    %c0_2 = arith.constant 0 : index
    %3 = vector.load %arg3[%c0, %c0_1, %c0_2] : memref<1x4x256xf32, #tpu.memory_space<vmem>>, vector<1x4x256xf32>
    %4 = vector.shape_cast %3 : vector<1x4x256xf32> to vector<4x256xf32>
    %c0_3 = arith.constant 0 : index
    %c0_4 = arith.constant 0 : index
    %c0_5 = arith.constant 0 : index
    %5 = vector.load %arg4[%c0_3, %c0_4, %c0_5] : memref<1x4x256xf32, #tpu.memory_space<vmem>>, vector<1x4x256xf32>
    %6 = vector.shape_cast %5 : vector<1x4x256xf32> to vector<4x256xf32>
    %cst = arith.constant dense<0xFF800000> : vector<256xf32>
    %7 = vector.multi_reduction <maximumf>, %4, %cst [0] : vector<4x256xf32> to vector<256xf32>
    %8 = vector.shape_cast %7 : vector<256xf32> to vector<1x256xf32>
    %9 = vector.broadcast %8 : vector<1x256xf32> to vector<4x256xf32>
    %10 = arith.subf %4, %9 : vector<4x256xf32>
    %11 = math.exp %10 : vector<4x256xf32>
    %cst_6 = arith.constant dense<0.000000e+00> : vector<256xf32>
    %12 = vector.multi_reduction <add>, %11, %cst_6 [0] : vector<4x256xf32> to vector<256xf32>
    %13 = vector.shape_cast %12 : vector<256xf32> to vector<1x256xf32>
    %14 = tpu.reciprocal %13 {approx = true} : vector<1x256xf32> -> vector<1x256xf32>
    %15 = arith.mulf %13, %14 : vector<1x256xf32>
    %cst_7 = arith.constant 2.000000e+00 : f32
    %16 = vector.broadcast %cst_7 : f32 to vector<1x256xf32>
    %17 = arith.subf %16, %15 : vector<1x256xf32>
    %18 = arith.mulf %14, %17 : vector<1x256xf32>
    %19 = vector.broadcast %18 : vector<1x256xf32> to vector<4x256xf32>
    %20 = arith.mulf %11, %19 : vector<4x256xf32>
    %21 = arith.mulf %20, %6 : vector<4x256xf32>
    %cst_8 = arith.constant dense<0.000000e+00> : vector<4xf32>
    %22 = vector.multi_reduction <add>, %21, %cst_8 [1] : vector<4x256xf32> to vector<4xf32>
    %cst_9 = arith.constant dense<0.000000e+00> : vector<4xf32>
    %23 = vector.multi_reduction <add>, %20, %cst_9 [1] : vector<4x256xf32> to vector<4xf32>
    %cst_10 = arith.constant dense<0.000000e+00> : vector<4xf32>
    %24 = vector.multi_reduction <add>, %6, %cst_10 [1] : vector<4x256xf32> to vector<4xf32>
    %25 = vector.shape_cast %22 : vector<4xf32> to vector<1x4xf32>
    %26 = vector.shape_cast %23 : vector<4xf32> to vector<1x4xf32>
    %27 = vector.shape_cast %24 : vector<4xf32> to vector<1x4xf32>
    %28 = tpu.concatenate %25, %26, %27 in 0 : vector<1x4xf32>, vector<1x4xf32>, vector<1x4xf32> -> vector<3x4xf32>
    %c0_11 = arith.constant 0 : index
    %c0_12 = arith.constant 0 : index
    %c0_13 = arith.constant 0 : index
    %c0_14 = arith.constant 0 : index
    %29 = vector.load %arg5[%c0_11, %c0_12, %c0_13, %c0_14] : memref<1x1x3x4xf32, #tpu.memory_space<vmem>>, vector<1x1x3x4xf32>
    %30 = vector.shape_cast %29 : vector<1x1x3x4xf32> to vector<3x4xf32>
    %31 = arith.addf %30, %28 : vector<3x4xf32>
    %c0_15 = arith.constant 0 : index
    %c0_16 = arith.constant 0 : index
    %c0_17 = arith.constant 0 : index
    %c0_18 = arith.constant 0 : index
    %32 = vector.load %arg5[%c0_15, %c0_16, %c0_17, %c0_18] : memref<1x1x3x4xf32, #tpu.memory_space<vmem>>, vector<1x1x3x4xf32>
    %33 = vector.shape_cast %32 : vector<1x1x3x4xf32> to vector<3x4xf32>
    %34 = vector.shape_cast %31 : vector<3x4xf32> to vector<1x1x3x4xf32>
    tpu.vector_store %arg5[%c0_15, %c0_16, %c0_17, %c0_18], %34 {strides = array<i32>} : memref<1x1x3x4xf32, #tpu.memory_space<vmem>>, vector<1x1x3x4xf32>,
    return
  }
  func.func @transform_0(%arg0: i32, %arg1: i32, %arg2: i32) -> (i32, i32, i32) {
    %c1_i32 = arith.constant 1 : i32
    %0 = arith.muli %arg1, %c1_i32 : i32
    %1 = arith.addi %0, %arg2 : i32
    %c0_i32 = arith.constant 0 : i32
    %c0_i32_0 = arith.constant 0 : i32
    return %arg0, %c0_i32, %1 : i32, i32, i32
  }
  func.func @transform_1(%arg0: i32, %arg1: i32, %arg2: i32) -> (i32, i32, i32) {
    %c1_i32 = arith.constant 1 : i32
    %0 = arith.muli %arg1, %c1_i32 : i32
    %1 = arith.addi %0, %arg2 : i32
    %c0_i32 = arith.constant 0 : i32
    %c0_i32_0 = arith.constant 0 : i32
    return %arg0, %c0_i32, %1 : i32, i32, i32
  }
  func.func @transform_2(%arg0: i32, %arg1: i32, %arg2: i32) -> (i32, i32, i32, i32) {
    %c0_i32 = arith.constant 0 : i32
    %c0_i32_0 = arith.constant 0 : i32
    %c0_i32_1 = arith.constant 0 : i32
    return %arg0, %arg1, %c0_i32, %c0_i32_0 : i32, i32, i32, i32
  }
}

</mosaic_0001>

<bundles_post_ra>
// kernel: dice_loss.1
= control target key start
LH: loop header
LB: loop body
LE: loop exit
PB: predicated region body
PF: predicated region fallthrough
CT: control target
= control target key end

     0   :  { %s542_s9 = smov 0   ;;  %s544_s10 = smov 0   ;;  %s600_s0 = inlined_call_operand.vmem [shape: f32[2,4,256], index: 0, kind: input, shape index: {}]   ;;  %s601_s1 = inlined_call_operand.vmem [shape: f32[2,4,256], index: 1, kind: input, shape index: {}]   ;;  %s602_s2 = inlined_call_operand.vmem [shape: f32[2,1,3,4], index: 2, kind: output, shape index: {}]  }
   0x1   :  { %s546_s11 = smov 0  }
   0x2 LB: > { %s31_s12 = sadd.s32 1, %s520_s10  ;;  %p461_p0 = scmp.ge.s32.totalorder %s524_s11, 1  ;;  %s524_s11 = sphi %s546_s11, %s12_s11   ;;  %s520_s10 = sphi %s544_s10, %s604_s10   ;;  %s516_s9 = sphi %s542_s9, %s603_s9  }
   0x3   : > { %p33_p1 = scmp.ge.s32.totalorder %s31_s12, 2  ;;  %p165_p2 = scmp.lt.s32.totalorder %s524_s11, 3 }
   0x5   : > { %s606_s12 = smov (%p33_p1, %s31_s12), 0  ;;  %p166_p3 = pnand %p461_p0, %p165_p2 }
   0x6   : > { %p206_p4 = scmp.lt.s32.totalorder (!%p166_p3), %s516_s9, 1 }
   0x7   : > { %169 = sbr.rel (%p166_p3) target bundleno = 242 (0xf2), region = 28 }
   0xc   : > { %s608_s9 = smov (!%p206_p4, %s516_s9), 1  ;;  %vm249_vm0 = vcmask 1043456   ;;  %vm239_vm1 = vcmask 26624   ;;  %vm351_vm2 = vcmask 1040384   ;;  %vm353_vm3 = vcmask 1041408  }
   0xd   : > { %s469_s13 = sshll.u32 %s608_s9, 3  ;;  %s466_s20 = sshll.u32 %s608_s9, 2 }
   0xe   : > { %s213_s16 = scalar_lea.vmem %s600_s0, %s469_s13  ;;  %s225_s19 = scalar_lea.vmem %s601_s1, %s469_s13 }
   0xf   : > { %v241_v0 = vld [vmem:[%s213_s16] sm:$0xff]  ;;  %s234_s23 = scalar_lea.vmem %s602_s2, %s466_s20 }
  0x10   : > { %244 = vst [vmem:[#allocation1] ss:$2 sm:$0xff] %v241_v0  ;;  %v242_v47 = vld [vmem:[%s225_s19] sm:$0xff] }
  0x17   : > { %v245_v1 = vld.sshfl [vmem:[#allocation1] sm:$0xff pattern:$0x75316420]  ;;  %v246_v2 = vld.sshfl [vmem:[#allocation1 + $0x8] sm:$0xff pattern:$0x75316420] }
  0x18   : > { %v250_v3 = vsel %vm249_vm0, %v245_v1, -inf  ;;  %v257_v4 = vsel %vm249_vm0, %v246_v2, -inf  ;;  %v526_v2 = vmov 0.0  }
  0x19   : > { %v251_v5 = vrot.slane %v250_v3, 4  ;;  %v258_v6 = vrot.slane %v257_v4, 4  ;;  %240 = vst.msk [vmem:[%s234_s23] sm:$0x7] %vm239_vm1, %v526_v2 }
  0x1b   : > { %v252_v7 = vmax.f32 %v250_v3, %v251_v5  ;;  %v259_v8 = vmax.f32 %v257_v4, %v258_v6  ;;  %v341_v4 = vlaneseq }
  0x1d   : > { %v253_v9 = vrot.slane %v252_v7, 2  ;;  %v260_v10 = vrot.slane %v259_v8, 2  ;;  %v342_v5 = vand.u32 127, %v341_v4 }
  0x1f   : > { %v254_v11 = vmax.f32 %v252_v7, %v253_v9  ;;  %v261_v12 = vmax.f32 %v259_v8, %v260_v10 }
  0x20   : > { %v355_v10 = vld [vmem:[%s234_s23] sm:$0x7] }
  0x21   : > { %v255_v13 = vrot.slane %v254_v11, 1  ;;  %v262_v14 = vrot.slane %v261_v12, 1 }
  0x23   : > { %v256_v15 = vmax.f32 %v254_v11, %v255_v13  ;;  %v263_v16 = vmax.f32 %v261_v12, %v262_v14 }
  0x25   : > { %v266_v17 = vrot.slane %v263_v16, 4 }
  0x27   : > { %v267_v18 = vsel %vm249_vm0, %v256_v15, %v266_v17 }
  0x28   : > { %v269_v19 = vsub.f32 %v241_v0, %v267_v18 }
  0x2a   : > { %v270_v20 = vmul.f32 1.442695, %v269_v19 }
  0x2c   : > { %496 = vpow2.f32 %v270_v20 }
  0x32   : > { %v497_v21 = vpop.eup %496 }
  0x33   : > { %273 = vst [vmem:[#allocation1] ss:$2 sm:$0xff] %v497_v21 }
  0x3a   : > { %v274_v22 = vld.sshfl [vmem:[#allocation1] sm:$0xff pattern:$0x75316420]  ;;  %v275_v23 = vld.sshfl [vmem:[#allocation1 + $0x8] sm:$0xff pattern:$0x75316420] }
  0x3b   : > { %v278_v24 = vsel %vm249_vm0, %v274_v22, 0.0  ;;  %v285_v25 = vsel %vm249_vm0, %v275_v23, 0.0 }
  0x3c   : > { %v279_v26 = vrot.slane %v278_v24, 4  ;;  %v286_v27 = vrot.slane %v285_v25, 4 }
  0x3e   : > { %v280_v28 = vadd.f32 %v279_v26, %v278_v24  ;;  %v287_v29 = vadd.f32 %v286_v27, %v285_v25 }
  0x40   : > { %v281_v30 = vrot.slane %v280_v28, 2  ;;  %v288_v31 = vrot.slane %v287_v29, 2 }
  0x42   : > { %v282_v32 = vadd.f32 %v281_v30, %v280_v28  ;;  %v289_v33 = vadd.f32 %v288_v31, %v287_v29 }
  0x44   : > { %v283_v34 = vrot.slane %v282_v32, 1  ;;  %v290_v35 = vrot.slane %v289_v33, 1 }
  0x46   : > { %v284_v36 = vadd.f32 %v283_v34, %v282_v32  ;;  %v291_v37 = vadd.f32 %v290_v35, %v289_v33 }
  0x48   : > { %498 = vrcp.f32 %v284_v36 }
  0x49   : > { %500 = vrcp.f32 %v291_v37 }
  0x4e   : > { %v499_v38 = vpop.eup %498 }
  0x4f   : > { %v501_v39 = vpop.eup %500  ;;  %v294_v40 = vmul.f32 %v499_v38, %v284_v36 }
  0x50   : > { %v295_v41 = vmul.f32 %v501_v39, %v291_v37 }
  0x51   : > { %v296_v42 = vsub.f32 2.0, %v294_v40 }
  0x52   : > { %v297_v43 = vsub.f32 2.0, %v295_v41 }
  0x53   : > { %v298_v44 = vmul.f32 %v499_v38, %v296_v42 }
  0x54   : > { %v299_v45 = vmul.f32 %v501_v39, %v297_v43 }
  0x56   : > { %v302_v46 = vrot.slane %v299_v45, 4 }
  0x58   : > { %v303_v48 = vsel %vm249_vm0, %v298_v44, %v302_v46 }
  0x59   : > { %v305_v49 = vmul.f32 %v497_v21, %v303_v48 }
  0x5b   : > { %v306_v50 = vmul.f32 %v305_v49, %v242_v47 }
  0x5d   : > { %308 = vst [vmem:[#allocation1] ss:$2 sm:$0xff] %v306_v50 }
  0x64   : > { %v309_v51 = vld.sshfl [vmem:[#allocation1] sm:$0xff pattern:$0x75316420]  ;;  %v310_v52 = vld.sshfl [vmem:[#allocation1 + $0x8] sm:$0xff pattern:$0x75316420] }
  0x65   : > { %v313_v53 = vsel %vm249_vm0, %v309_v51, 0.0  ;;  %v314_v54 = vsel %vm249_vm0, %v310_v52, 0.0  ;;  %319 = vst [vmem:[#allocation1] ss:$2 sm:$0xff] %v305_v49 }
  0x66   : > { %v315_v55 = vadd.f32 %v314_v54, %v313_v53 }
  0x68   : > { %316 = vadd.xlane.f32.xlu0 %v315_v55 }
  0x6c   : > { %v320_v56 = vld.sshfl [vmem:[#allocation1] sm:$0xff pattern:$0x75316420]  ;;  %v321_v57 = vld.sshfl [vmem:[#allocation1 + $0x8] sm:$0xff pattern:$0x75316420] }
  0x6d   : > { %v324_v58 = vsel %vm249_vm0, %v320_v56, 0.0  ;;  %v325_v59 = vsel %vm249_vm0, %v321_v57, 0.0  ;;  %330 = vst [vmem:[#allocation1] ss:$2 sm:$0xff] %v242_v47 }
  0x6e   : > { %v326_v60 = vadd.f32 %v325_v59, %v324_v58 }
  0x70   : > { %327 = vadd.xlane.f32.xlu0 %v326_v60 }
  0x74   : > { %v331_v61 = vld.sshfl [vmem:[#allocation1] sm:$0xff pattern:$0x75316420]  ;;  %v332_v62 = vld.sshfl [vmem:[#allocation1 + $0x8] sm:$0xff pattern:$0x75316420] }
  0x75   : > { %v335_v63 = vsel %vm249_vm0, %v331_v61, 0.0  ;;  %v336_v0 = vsel %vm249_vm0, %v332_v62, 0.0 }
  0x76   : > { %v337_v1 = vadd.f32 %v336_v0, %v335_v63 }
  0x78   : > { %338 = vadd.xlane.f32.xlu1 %v337_v1 }
  0xdb   : > { %v317_v3 = vpop.xlane.xlu0 %316 }
  0xdc   : > { %v343_v7 = vperm.slane %v317_v3, %v342_v5 }
  0xe3   : > { %v328_v6 = vpop.xlane.xlu0 %327 }
  0xe4   : > { %v346_v8 = vperm.slane %v328_v6, %v342_v5 }
  0xe6   : > { %v352_v12 = vsel %vm351_vm2, %v343_v7, %v346_v8 }
  0xeb   : > { %v339_v9 = vpop.xlane.xlu1 %338 }
  0xec   : > { %v349_v11 = vperm.slane %v339_v9, %v342_v5 }
  0xee   : > { %v354_v13 = vsel %vm353_vm3, %v352_v12, %v349_v11 }
  0xef   : > { %v356_v14 = vadd.f32 %v355_v10, %v354_v13 }
  0xf1   : > { %358 = vst.msk [vmem:[%s234_s23] sm:$0x7] %vm239_vm1, %v356_v14 }
  0xf2 PF: > { %s12_s11 = sadd.s32 1, %s524_s11   ;;  %s603_s9 = smov %s520_s10 }
  0xf3   : > { %p9_p5 = scmp.ge.s32.totalorder %s12_s11, 4   ;;  %s604_s10 = smov %s606_s12 }
  0xf5   :  { %11 = sbr.rel (!%p9_p5) target bundleno = 2 (0x2), region = 65 }

</bundles_post_ra>
